<compile_context>
chip_gen: v7x
topology: tpu7x:2x2x1
jax: 0.10.0
libtpu: 0.0.40
codegen_flags: <defaults>
</compile_context>

<pallas_src>
import jax
import jax.numpy as jnp
from jax.experimental import pallas as pl
from jax.experimental.pallas import tpu as pltpu


# --------------------------------------------------------------------------- #
# Kernel
# --------------------------------------------------------------------------- #
def _state_discriminator_kernel(scalars_ref,    # SMEM (2,): [b2, 1/c]
                                x_ref,          # VMEM [TB, D]  (f32 or bf16)
                                w1_ref,         # VMEM [D, H]   (BN folded in)
                                b1_ref,         # VMEM [1, H]   f32
                                w2_ref,         # VMEM [1, H]   f32 (second Linear row)
                                out_ref):       # VMEM [TB, 2] -> (s, s/c)
    # Linear(D -> H) with eval-mode BatchNorm folded into (w1, b1).  Do the dot in the
    # weights' dtype (native bf16 MXU path when params are bf16), accumulate in f32.
    x = x_ref[...].astype(w1_ref.dtype)
    h = jnp.dot(x, w1_ref[...], preferred_element_type=jnp.float32) + b1_ref[...]
    h = jnp.maximum(h, 0.0)
    # TODO(synk): eval-mode semantics only -- Dropout is identity and BatchNorm uses
    #             folded running stats; train-mode masking / batch statistics omitted.

    # Linear(H -> 1): VPU broadcast-multiply + lane reduce instead of an N=1 MXU matmul.
    logits = jnp.sum(h * w2_ref[...], axis=-1, keepdims=True) + scalars_ref[0]

    # Sigmoid via EUP exp + EUP approximate reciprocal (VALU/store slots stay free).
    s = pl.reciprocal(1.0 + jnp.exp(-logits), approx=True)

    # Single [TB, 2] store: lane 0 = s, lane 1 = s * (1/c).
    lane = jax.lax.broadcasted_iota(jnp.int32, (1, 2), 1)
    lane_scale = jnp.where(lane == 0, jnp.float32(1.0), scalars_ref[1])
    out_ref[...] = s * lane_scale


# --------------------------------------------------------------------------- #
# Parameter prep (one-time): fold eval-mode BatchNorm into the first Linear.
# --------------------------------------------------------------------------- #
def fold_params(params, eps=1e-5, compute_dtype=jnp.bfloat16):
    scale = params["gamma"] * jax.lax.rsqrt(params["var"] + eps)   # [1, D]
    shift = params["beta"] - params["mean"] * scale                # [1, D]
    w1_folded = scale.reshape(-1, 1) * params["w1"]                # [D, H]
    b1_folded = params["b1"] + shift @ params["w1"]                # [1, H]
    return {
        "w1": w1_folded.astype(compute_dtype),      # bf16 default: native MXU, half the DMA
        "b1": b1_folded.astype(jnp.float32),        # post-matmul math stays f32
        "w2_row": params["w2"].reshape(1, -1).astype(jnp.float32),  # [1, H]
        "b2": params["b2"].reshape(()).astype(jnp.float32),         # scalar
    }


# --------------------------------------------------------------------------- #
# VMEM accounting / tile sizing
# --------------------------------------------------------------------------- #
def _round_up(x, m):
    return ((x + m - 1) // m) * m


def _round_down(x, m):
    return (x // m) * m


def _vmem_capacity_bytes():
    try:
        info = pltpu.get_tpu_info()
        for name in ("vmem_capacity_bytes", "vmem_bytes", "vmem_size_bytes"):
            v = getattr(info, name, None)
            if v:
                return int(v)
    except Exception:
        pass
    return 64 * 1024 * 1024            # conservative fallback: v7x physical VMEM


def _padded_tile_bytes(rows, cols, dtype):
    """VMEM footprint of a (rows, cols) tile including lane/sublane padding."""
    itemsize = jnp.dtype(dtype).itemsize
    sub = max(8, 32 // itemsize)       # f32 -> 8 sublanes, bf16 -> 16, int8 -> 32
    return _round_up(max(rows, 1), sub) * _round_up(max(cols, 1), 128) * itemsize


def _per_row_bytes(cols, dtype):
    return _round_up(max(cols, 1), 128) * jnp.dtype(dtype).itemsize


def _choose_block_b(B, D, H, x_dtype, w_dtype, vmem_budget_bytes,
                    x_buffers, weight_buffers, target_x_tile_bytes=4 * 1024 * 1024):
    """Batch tile: as big as the VMEM budget allows, targeting ~4 MiB of x per step,
    never collapsing to a single grid step when B > 8 (v7x megacore needs >= 2)."""
    wb = 2 if weight_buffers is None else weight_buffers
    xb = 2 if x_buffers is None else x_buffers
    # VMEM-resident weights (each buffered wb times by the pipeline).
    resident = wb * (_padded_tile_bytes(D, H, w_dtype)
                     + _padded_tile_bytes(1, H, jnp.float32)       # b1'
                     + _padded_tile_bytes(1, H, jnp.float32))      # w2 row
    # Per-batch-row VMEM: pipelined x tile, pipelined out tile, f32 intermediates.
    per_row = (xb * _per_row_bytes(D, x_dtype)
               + 2 * _per_row_bytes(2, jnp.float32)
               + 2 * _per_row_bytes(H, jnp.float32))
    tb_vmem = (vmem_budget_bytes - resident) // max(per_row, 1)
    # Amortize the ~0.35 us/step grid overhead: ~4 MiB of useful x bytes per step.
    tb_target = target_x_tile_bytes // max(D * jnp.dtype(x_dtype).itemsize, 1)
    tb = max(8, _round_down(min(tb_vmem, tb_target), 8))
    if tb >= B:
        if B <= 8:
            return B                    # single full block; nothing to split
        # Keep >= 2 grid steps so ("parallel",) can use both v7x TensorCores.
        tb = max(8, _round_down(-(-B // 2), 8))
    return tb


# --------------------------------------------------------------------------- #
# Wrapper
# --------------------------------------------------------------------------- #
def state_discriminator(x, folded, c=1.0, *, block_b=None, x_buffers=None,
                        weight_buffers=1, vmem_limit_bytes=None):
    """Returns (s, s / c), matching StateDiscriminator.forward (eval mode)."""
    B, D = x.shape
    H = folded["w1"].shape[1]

    if vmem_limit_bytes is None:
        # ~75% of physical VMEM: big tiles on v5e/v6e (128 MiB), headroom on v7x (64 MiB).
        vmem_limit_bytes = int(_vmem_capacity_bytes()) * 3 // 4
    tile_budget = vmem_limit_bytes * 3 // 5        # slack for compiler temporaries

    if block_b is None:
        tb = _choose_block_b(B, D, H, x.dtype, folded["w1"].dtype, tile_budget,
                             x_buffers, weight_buffers)
    else:
        tb = int(block_b)
    num_blocks = pl.cdiv(B, tb)

    inv_c = jnp.float32(1.0) / jnp.asarray(c, dtype=jnp.float32)
    scalars = jnp.stack([folded["b2"].astype(jnp.float32), inv_c])   # (2,) f32 -> SMEM

    def _invoke(use_buffer_hints):
        def spec(shape, index_map, buffers):
            if buffers is None or not use_buffer_hints:
                return pl.BlockSpec(shape, index_map)
            return pl.BlockSpec(shape, index_map, pipeline_mode=pl.Buffered(buffers))

        return pl.pallas_call(
            _state_discriminator_kernel,
            out_shape=jax.ShapeDtypeStruct((B, 2), jnp.float32),
            grid=(num_blocks,),
            in_specs=[
                pl.BlockSpec(memory_space=pltpu.MemorySpace.SMEM),       # [b2, 1/c]
                spec((tb, D), lambda i: (i, 0), x_buffers),              # x tile (pipelined)
                spec((D, H), lambda i: (0, 0), weight_buffers),          # w1' (resident)
                spec((1, H), lambda i: (0, 0), weight_buffers),          # b1'
                spec((1, H), lambda i: (0, 0), weight_buffers),          # w2 row
            ],
            out_specs=pl.BlockSpec((tb, 2), lambda i: (i, 0)),
            compiler_params=pltpu.CompilerParams(
                dimension_semantics=("parallel",),    # v7x: shard batch across 2 TCs
                vmem_limit_bytes=vmem_limit_bytes,
            ),
        )(scalars, x, folded["w1"], folded["b1"], folded["w2_row"])

    try:
        out = _invoke(True)
    except Exception:
        # Fallback for jax versions without pipeline_mode=pl.Buffered support:
        # identical semantics, default double-buffering everywhere.
        out = _invoke(False)

    return out[:, 0:1], out[:, 1:2]


# --------------------------------------------------------------------------- #
# Synthetic params + pure-JAX reference (uses the *unfolded* params, so it also
# validates the BN fold).
# --------------------------------------------------------------------------- #
def init_params(key, cate_num, hidden_dim):
    k = jax.random.split(key, 6)
    return {
        "gamma": jax.random.normal(k[0], (1, cate_num), jnp.float32) * 0.1 + 1.0,
        "beta":  jax.random.normal(k[1], (1, cate_num), jnp.float32) * 0.1,
        "mean":  jax.random.normal(k[2], (1, cate_num), jnp.float32) * 0.05,
        "var":   jnp.abs(jax.random.normal(k[3], (1, cate_num), jnp.float32)) * 0.1 + 1.0,
        "w1": jax.random.normal(k[4], (cate_num, hidden_dim), jnp.float32) * 0.1,
        "b1": jnp.zeros((1, hidden_dim), jnp.float32),
        "w2": jax.random.normal(k[5], (hidden_dim, 1), jnp.float32) * 0.1,
        "b2": jnp.zeros((1, 1), jnp.float32),
    }


def reference(x, p, c=1.0, eps=1e-5):
    xn = (x - p["mean"]) / jnp.sqrt(p["var"] + eps) * p["gamma"] + p["beta"]
    h = jnp.maximum(xn @ p["w1"] + p["b1"], 0.0)
    s = jax.nn.sigmoid(h @ p["w2"] + p["b2"])
    return s, s / c


# --------------------------------------------------------------------------- #
# Main
# --------------------------------------------------------------------------- #
if __name__ == "__main__":
    key = jax.random.PRNGKey(0)
    k_x, k_p, k_x2, k_x3 = jax.random.split(key, 4)

    cate_num, sd_hidden_dim = 16, 32          # args.cate_num, args.sd_hidden_dim
    params = init_params(k_p, cate_num, sd_hidden_dim)

    # --- toy-size f32 path (single grid step; validates BN fold + fused math) ---
    folded_f32 = fold_params(params, compute_dtype=jnp.float32)
    x = jax.random.normal(k_x, (8, cate_num), jnp.float32)
    s, s_scaled = state_discriminator(x, folded_f32, c=1.0)
    jax.block_until_ready((s, s_scaled))
    s_ref, s_scaled_ref = reference(x, params, c=1.0)
    # residual error comes only from the EUP approx-reciprocal sigmoid
    assert jnp.allclose(s, s_ref, atol=2e-3), "s mismatch (f32, B=8)"
    assert jnp.allclose(s_scaled, s_scaled_ref, atol=2e-3), "s/c mismatch (f32, B=8)"

    # --- bf16 params + bf16 activations, explicit multi-block grid, non-unit c ---
    folded_bf16 = fold_params(params)                       # default compute_dtype=bf16
    x2 = jax.random.normal(k_x2, (48, cate_num), jnp.float32).astype(jnp.bfloat16)
    s2, s2_scaled = state_discriminator(x2, folded_bf16, c=2.5, block_b=16)
    jax.block_until_ready((s2, s2_scaled))
    s2_ref, s2_scaled_ref = reference(x2.astype(jnp.float32), params, c=2.5)
    assert jnp.allclose(s2, s2_ref, atol=2e-2), "s mismatch (bf16, B=48)"
    assert jnp.allclose(s2_scaled, s2_scaled_ref, atol=2e-2), "s/c mismatch (bf16, B=48)"

    # --- auto tile sizing: byte-based tb choice + forced >=2 grid steps (megacore) ---
    x3 = jax.random.normal(k_x3, (1024, cate_num), jnp.float32).astype(jnp.bfloat16)
    s3, s3_scaled = state_discriminator(x3, folded_bf16, c=3.0)
    jax.block_until_ready((s3, s3_scaled))
    s3_ref, s3_scaled_ref = reference(x3.astype(jnp.float32), params, c=3.0)
    assert jnp.allclose(s3, s3_ref, atol=2e-2), "s mismatch (bf16, B=1024)"
    assert jnp.allclose(s3_scaled, s3_scaled_ref, atol=2e-2), "s/c mismatch (bf16, B=1024)"

    print("KERNEL_OK")
</pallas_src>

<mosaic_0001>
module attributes {stable_mosaic.version = 11 : i64} {
  func.func @_state_discriminator_kernel(%arg0: i32, %arg1: memref<2xf32, #tpu.memory_space<smem>>, %arg2: memref<8x16xf32, #tpu.memory_space<vmem>>, %arg3: memref<16x32xf32, #tpu.memory_space<vmem>>, %arg4: memref<1x32xf32, #tpu.memory_space<vmem>>, %arg5: memref<1x32xf32, #tpu.memory_space<vmem>>, %arg6: memref<8x2xf32, #tpu.memory_space<vmem>>) attributes {dimension_semantics = [#tpu.dimension_semantics<parallel>], iteration_bounds = array<i64: 1>, scalar_prefetch = 0 : i64, scratch_operands = 0 : i64, tpu.core_type = #tpu.core_type<tc>, window_params = [{transform_indices = @transform_0, window_bounds = array<i64: 2>}, {transform_indices = @transform_1, window_bounds = array<i64: 8, 16>}, {pipeline_mode = #tpu.pipeline_mode<synchronous>, transform_indices = @transform_2, window_bounds = array<i64: 16, 32>}, {pipeline_mode = #tpu.pipeline_mode<synchronous>, transform_indices = @transform_3, window_bounds = array<i64: 1, 32>}, {pipeline_mode = #tpu.pipeline_mode<synchronous>, transform_indices = @transform_4, window_bounds = array<i64: 1, 32>}, {transform_indices = @transform_5, window_bounds = array<i64: 8, 2>}]} {
    %c0 = arith.constant 0 : index
    %c0_0 = arith.constant 0 : index
    %0 = vector.load %arg2[%c0, %c0_0] : memref<8x16xf32, #tpu.memory_space<vmem>>, vector<8x16xf32>
    %c0_1 = arith.constant 0 : index
    %c0_2 = arith.constant 0 : index
    %1 = vector.load %arg3[%c0_1, %c0_2] : memref<16x32xf32, #tpu.memory_space<vmem>>, vector<16x32xf32>
    %cst = arith.constant dense<0.000000e+00> : vector<8x32xf32>
    %2 = tpu.matmul %0, %1, %cst {dimension_numbers = #tpu.dot_dimension_numbers<[1], [0], [0], [1], [0, 0, 1, 1], [], []>} : vector<8x16xf32>, vector<16x32xf32>, vector<8x32xf32> -> vector<8x32xf32>
    %c0_3 = arith.constant 0 : index
    %c0_4 = arith.constant 0 : index
    %3 = vector.load %arg4[%c0_3, %c0_4] : memref<1x32xf32, #tpu.memory_space<vmem>>, vector<1x32xf32>
    %4 = vector.broadcast %3 : vector<1x32xf32> to vector<8x32xf32>
    %5 = arith.addf %2, %4 : vector<8x32xf32>
    %cst_5 = arith.constant 0.000000e+00 : f32
    %6 = vector.broadcast %cst_5 : f32 to vector<8x32xf32>
    %7 = arith.maximumf %5, %6 : vector<8x32xf32>
    %c0_6 = arith.constant 0 : index
    %c0_7 = arith.constant 0 : index
    %8 = vector.load %arg5[%c0_6, %c0_7] : memref<1x32xf32, #tpu.memory_space<vmem>>, vector<1x32xf32>
    %9 = vector.broadcast %8 : vector<1x32xf32> to vector<8x32xf32>
    %10 = arith.mulf %7, %9 : vector<8x32xf32>
    %cst_8 = arith.constant dense<0.000000e+00> : vector<8xf32>
    %11 = vector.multi_reduction <add>, %10, %cst_8 [1] : vector<8x32xf32> to vector<8xf32>
    %12 = vector.shape_cast %11 : vector<8xf32> to vector<8x1xf32>
    %c0_9 = arith.constant 0 : index
    %13 = memref.load %arg1[%c0_9] : memref<2xf32, #tpu.memory_space<smem>>
    %14 = vector.broadcast %13 : f32 to vector<8x1xf32>
    %15 = arith.addf %12, %14 : vector<8x1xf32>
    %cst_10 = arith.constant 0.000000e+00 : f32
    %16 = vector.broadcast %cst_10 : f32 to vector<8x1xf32>
    %17 = arith.subf %16, %15 : vector<8x1xf32>
    %18 = math.exp %17 : vector<8x1xf32>
    %cst_11 = arith.constant 1.000000e+00 : f32
    %19 = vector.broadcast %cst_11 : f32 to vector<8x1xf32>
    %20 = arith.addf %19, %18 : vector<8x1xf32>
    %21 = tpu.reciprocal %20 {approx = true} : vector<8x1xf32> -> vector<8x1xf32>
    %22 = tpu.iota {dimensions = array<i32: 1>} : vector<1x2xi32>
    %c0_i32 = arith.constant 0 : i32
    %23 = vector.broadcast %c0_i32 : i32 to vector<1x2xi32>
    %24 = arith.cmpi eq, %22, %23 : vector<1x2xi32>
    %c1 = arith.constant 1 : index
    %25 = memref.load %arg1[%c1] : memref<2xf32, #tpu.memory_space<smem>>
    %cst_12 = arith.constant 1.000000e+00 : f32
    %26 = vector.broadcast %cst_12 : f32 to vector<1x2xf32>
    %27 = vector.broadcast %25 : f32 to vector<1x2xf32>
    %28 = arith.select %24, %26, %27 : vector<1x2xi1>, vector<1x2xf32>
    %29 = vector.broadcast %21 : vector<8x1xf32> to vector<8x2xf32>
    %30 = vector.broadcast %28 : vector<1x2xf32> to vector<8x2xf32>
    %31 = arith.mulf %29, %30 : vector<8x2xf32>
    %c0_13 = arith.constant 0 : index
    %c0_14 = arith.constant 0 : index
    %32 = vector.load %arg6[%c0_13, %c0_14] : memref<8x2xf32, #tpu.memory_space<vmem>>, vector<8x2xf32>
    tpu.vector_store %arg6[%c0_13, %c0_14], %31 {strides = array<i32>} : memref<8x2xf32, #tpu.memory_space<vmem>>, vector<8x2xf32>,
    return
  }
  func.func @transform_0(%arg0: i32) -> i32 {
    %c0_i32 = arith.constant 0 : i32
    %c0_i32_0 = arith.constant 0 : i32
    return %c0_i32 : i32
  }
  func.func @transform_1(%arg0: i32) -> (i32, i32) {
    %c0_i32 = arith.constant 0 : i32
    %c0_i32_0 = arith.constant 0 : i32
    return %arg0, %c0_i32 : i32, i32
  }
  func.func @transform_2(%arg0: i32) -> (i32, i32) {
    %c0_i32 = arith.constant 0 : i32
    %c0_i32_0 = arith.constant 0 : i32
    %c0_i32_1 = arith.constant 0 : i32
    return %c0_i32, %c0_i32_0 : i32, i32
  }
  func.func @transform_3(%arg0: i32) -> (i32, i32) {
    %c0_i32 = arith.constant 0 : i32
    %c0_i32_0 = arith.constant 0 : i32
    %c0_i32_1 = arith.constant 0 : i32
    return %c0_i32, %c0_i32_0 : i32, i32
  }
  func.func @transform_4(%arg0: i32) -> (i32, i32) {
    %c0_i32 = arith.constant 0 : i32
    %c0_i32_0 = arith.constant 0 : i32
    %c0_i32_1 = arith.constant 0 : i32
    return %c0_i32, %c0_i32_0 : i32, i32
  }
  func.func @transform_5(%arg0: i32) -> (i32, i32) {
    %c0_i32 = arith.constant 0 : i32
    %c0_i32_0 = arith.constant 0 : i32
    return %arg0, %c0_i32 : i32, i32
  }
}

module attributes {stable_mosaic.version = 11 : i64} {
  func.func @_state_discriminator_kernel(%arg0: i32, %arg1: memref<2xf32, #tpu.memory_space<smem>>, %arg2: memref<8x16xf32, #tpu.memory_space<vmem>>, %arg3: memref<16x32xf32, #tpu.memory_space<vmem>>, %arg4: memref<1x32xf32, #tpu.memory_space<vmem>>, %arg5: memref<1x32xf32, #tpu.memory_space<vmem>>, %arg6: memref<8x2xf32, #tpu.memory_space<vmem>>) attributes {dimension_semantics = [#tpu.dimension_semantics<parallel>], iteration_bounds = array<i64: 1>, scalar_prefetch = 0 : i64, scratch_operands = 0 : i64, tpu.core_type = #tpu.core_type<tc>, window_params = [{transform_indices = @transform_0, window_bounds = array<i64: 2>}, {transform_indices = @transform_1, window_bounds = array<i64: 8, 16>}, {pipeline_mode = #tpu.pipeline_mode<synchronous>, transform_indices = @transform_2, window_bounds = array<i64: 16, 32>}, {pipeline_mode = #tpu.pipeline_mode<synchronous>, transform_indices = @transform_3, window_bounds = array<i64: 1, 32>}, {pipeline_mode = #tpu.pipeline_mode<synchronous>, transform_indices = @transform_4, window_bounds = array<i64: 1, 32>}, {transform_indices = @transform_5, window_bounds = array<i64: 8, 2>}]} {
    %c0 = arith.constant 0 : index
    %c0_0 = arith.constant 0 : index
    %0 = vector.load %arg2[%c0, %c0_0] : memref<8x16xf32, #tpu.memory_space<vmem>>, vector<8x16xf32>
    %c0_1 = arith.constant 0 : index
    %c0_2 = arith.constant 0 : index
    %1 = vector.load %arg3[%c0_1, %c0_2] : memref<16x32xf32, #tpu.memory_space<vmem>>, vector<16x32xf32>
    %cst = arith.constant dense<0.000000e+00> : vector<8x32xf32>
    %2 = tpu.matmul %0, %1, %cst {dimension_numbers = #tpu.dot_dimension_numbers<[1], [0], [0], [1], [0, 0, 1, 1], [], []>} : vector<8x16xf32>, vector<16x32xf32>, vector<8x32xf32> -> vector<8x32xf32>
    %c0_3 = arith.constant 0 : index
    %c0_4 = arith.constant 0 : index
    %3 = vector.load %arg4[%c0_3, %c0_4] : memref<1x32xf32, #tpu.memory_space<vmem>>, vector<1x32xf32>
    %4 = vector.broadcast %3 : vector<1x32xf32> to vector<8x32xf32>
    %5 = arith.addf %2, %4 : vector<8x32xf32>
    %cst_5 = arith.constant 0.000000e+00 : f32
    %6 = vector.broadcast %cst_5 : f32 to vector<8x32xf32>
    %7 = arith.maximumf %5, %6 : vector<8x32xf32>
    %c0_6 = arith.constant 0 : index
    %c0_7 = arith.constant 0 : index
    %8 = vector.load %arg5[%c0_6, %c0_7] : memref<1x32xf32, #tpu.memory_space<vmem>>, vector<1x32xf32>
    %9 = vector.broadcast %8 : vector<1x32xf32> to vector<8x32xf32>
    %10 = arith.mulf %7, %9 : vector<8x32xf32>
    %cst_8 = arith.constant dense<0.000000e+00> : vector<8xf32>
    %11 = vector.multi_reduction <add>, %10, %cst_8 [1] : vector<8x32xf32> to vector<8xf32>
    %12 = vector.shape_cast %11 : vector<8xf32> to vector<8x1xf32>
    %c0_9 = arith.constant 0 : index
    %13 = memref.load %arg1[%c0_9] : memref<2xf32, #tpu.memory_space<smem>>
    %14 = vector.broadcast %13 : f32 to vector<8x1xf32>
    %15 = arith.addf %12, %14 : vector<8x1xf32>
    %cst_10 = arith.constant 0.000000e+00 : f32
    %16 = vector.broadcast %cst_10 : f32 to vector<8x1xf32>
    %17 = arith.subf %16, %15 : vector<8x1xf32>
    %18 = math.exp %17 : vector<8x1xf32>
    %cst_11 = arith.constant 1.000000e+00 : f32
    %19 = vector.broadcast %cst_11 : f32 to vector<8x1xf32>
    %20 = arith.addf %19, %18 : vector<8x1xf32>
    %21 = tpu.reciprocal %20 {approx = true} : vector<8x1xf32> -> vector<8x1xf32>
    %22 = tpu.iota {dimensions = array<i32: 1>} : vector<1x2xi32>
    %c0_i32 = arith.constant 0 : i32
    %23 = vector.broadcast %c0_i32 : i32 to vector<1x2xi32>
    %24 = arith.cmpi eq, %22, %23 : vector<1x2xi32>
    %c1 = arith.constant 1 : index
    %25 = memref.load %arg1[%c1] : memref<2xf32, #tpu.memory_space<smem>>
    %cst_12 = arith.constant 1.000000e+00 : f32
    %26 = vector.broadcast %cst_12 : f32 to vector<1x2xf32>
    %27 = vector.broadcast %25 : f32 to vector<1x2xf32>
    %28 = arith.select %24, %26, %27 : vector<1x2xi1>, vector<1x2xf32>
    %29 = vector.broadcast %21 : vector<8x1xf32> to vector<8x2xf32>
    %30 = vector.broadcast %28 : vector<1x2xf32> to vector<8x2xf32>
    %31 = arith.mulf %29, %30 : vector<8x2xf32>
    %c0_13 = arith.constant 0 : index
    %c0_14 = arith.constant 0 : index
    %32 = vector.load %arg6[%c0_13, %c0_14] : memref<8x2xf32, #tpu.memory_space<vmem>>, vector<8x2xf32>
    tpu.vector_store %arg6[%c0_13, %c0_14], %31 {strides = array<i32>} : memref<8x2xf32, #tpu.memory_space<vmem>>, vector<8x2xf32>,
    return
  }
  func.func @transform_0(%arg0: i32) -> i32 {
    %c0_i32 = arith.constant 0 : i32
    %c0_i32_0 = arith.constant 0 : i32
    return %c0_i32 : i32
  }
  func.func @transform_1(%arg0: i32) -> (i32, i32) {
    %c0_i32 = arith.constant 0 : i32
    %c0_i32_0 = arith.constant 0 : i32
    return %arg0, %c0_i32 : i32, i32
  }
  func.func @transform_2(%arg0: i32) -> (i32, i32) {
    %c0_i32 = arith.constant 0 : i32
    %c0_i32_0 = arith.constant 0 : i32
    %c0_i32_1 = arith.constant 0 : i32
    return %c0_i32, %c0_i32_0 : i32, i32
  }
  func.func @transform_3(%arg0: i32) -> (i32, i32) {
    %c0_i32 = arith.constant 0 : i32
    %c0_i32_0 = arith.constant 0 : i32
    %c0_i32_1 = arith.constant 0 : i32
    return %c0_i32, %c0_i32_0 : i32, i32
  }
  func.func @transform_4(%arg0: i32) -> (i32, i32) {
    %c0_i32 = arith.constant 0 : i32
    %c0_i32_0 = arith.constant 0 : i32
    %c0_i32_1 = arith.constant 0 : i32
    return %c0_i32, %c0_i32_0 : i32, i32
  }
  func.func @transform_5(%arg0: i32) -> (i32, i32) {
    %c0_i32 = arith.constant 0 : i32
    %c0_i32_0 = arith.constant 0 : i32
    return %arg0, %c0_i32 : i32, i32
  }
}

</mosaic_0001>

<bundles_post_ra>
// kernel: tpu_custom_call.1
= control target key start
LH: loop header
LB: loop body
LE: loop exit
PB: predicated region body
PF: predicated region fallthrough
CT: control target
= control target key end

     0   :  { %10 = vsyncpa [#allocation4], 0  ;;  %s350_s0 = inlined_call_operand.hbm [shape: f32[2], index: 0, kind: input, shape index: {}]   ;;  %s351_s1 = inlined_call_operand.hbm [shape: f32[8,16], index: 1, kind: input, shape index: {}]   ;;  %s352_s2 = inlined_call_operand.hbm [shape: f32[16,32], index: 2, kind: input, shape index: {}]   ;;  %s353_s3 = inlined_call_operand.vmem [shape: f32[1,32], index: 3, kind: input, shape index: {}]   ;;  %s354_s4 = inlined_call_operand.vmem [shape: f32[1,32], index: 4, kind: input, shape index: {}]   ;;  %s355_s5 = inlined_call_operand.vmem [shape: f32[8,2], index: 5, kind: output, shape index: {}]  }
   0x1   :  { %11 = vsyncpa [#allocation3], 0 }
   0x2   :  { %12 = vsyncpa [#allocation7], 0  ;;  %s207_s20 = scalar_lea.hbm %s350_s0, 16 }
   0x3   :  { %p208_p0 = scmp.ne.s32.totalorder %s350_s0, %s207_s20  ;;  %p211_p1 = scmp.lt.u32.totalorder %s207_s20, %s350_s0 }
   0x5   :  { %p213_p2 = pnand %p211_p1, %p208_p0 }
   0x7   :  { %216 = shalt.err (!%p213_p2)
}
   0x8   :  { %s267_s25 = smov [#allocation2]   ;;  %s268_s28 = smov [#allocation5]  }
   0x9   :  { %20 = dma.hbm_to_smem %s350_s0, 16, %s267_s25, [#allocation4]  }
   0xa   :  { %s27_s29 = sshll.u32 %s268_s28, 4  ;;  %s269_s30 = smov [#allocation6]   ;;  %s28_s29 = int_to_ptr.vmem [resolvable:$true] %s27_s29 }
   0xb   :  { %s36_s6 = sshll.u32 %s269_s30, 4  ;;  %s217_s9 = scalar_lea.hbm %s351_s1, 128  ;;  %s37_s6 = int_to_ptr.vmem [resolvable:$true] %s36_s6 }
   0xc   :  { %p218_p3 = scmp.ne.s32.totalorder %s351_s1, %s217_s9  ;;  %p221_p4 = scmp.lt.u32.totalorder %s217_s9, %s351_s1 }
   0xe   :  { %p223_p5 = pnand %p221_p4, %p218_p3 }
  0x10   :  { %226 = shalt.err (!%p223_p5)
}
  0x11   :  { %s227_s0 = scalar_lea.vmem %s28_s29, 128  ;;  %p232_p7 = scmp.lt.s32.totalorder %s28_s29, %s28_s29 }
  0x12   :  { %p228_p6 = scmp.ne.s32.totalorder %s28_s29, %s227_s0  ;;  %p233_p8 = scmp.lt.s32.totalorder %s227_s0, %s227_s0 }
  0x14   :  { %p234_p9 = por %p233_p8, %p232_p7 }
  0x16   :  { %p235_p10 = pnand %p234_p9, %p228_p6 }
  0x18   :  { %238 = shalt.err (!%p235_p10)
}
  0x19   :  { %30 = dma.hbm_to_vmem [thread:$0]  %s351_s1, 128, %s28_s29, [#allocation3]  }
  0x1a   :  { %s239_s18 = scalar_lea.hbm %s352_s2, 256 }
  0x1b   :  { %p240_p11 = scmp.ne.s32.totalorder %s352_s2, %s239_s18  ;;  %p243_p12 = scmp.lt.u32.totalorder %s239_s18, %s352_s2 }
  0x1d   :  { %p245_p13 = pnand %p243_p12, %p240_p11 }
  0x1f   :  { %248 = shalt.err (!%p245_p13)
}
  0x20   :  { %s249_s23 = scalar_lea.vmem %s37_s6, 256  ;;  %p254_p1 = scmp.lt.s32.totalorder %s37_s6, %s37_s6 }
  0x21   :  { %p250_p0 = scmp.ne.s32.totalorder %s37_s6, %s249_s23  ;;  %p255_p2 = scmp.lt.s32.totalorder %s249_s23, %s249_s23 }
  0x23   :  { %p256_p3 = por %p255_p2, %p254_p1 }
  0x25   :  { %p257_p4 = pnand %p256_p3, %p250_p0 }
  0x27   :  { %260 = shalt.err (!%p257_p4)
}
  0x28   :  { %s270_s1 = smov 128   ;;  %s271_s24 = smov 8  }
  0x29   :  { %42 = dma.hbm_to_vmem [thread:$0]  %s352_s2, 256, %s37_s6, [#allocation7], %s270_s1, %s270_s1, %s271_s24  }
  0x2a   :  { %261 = dma.done.wait [#allocation4], 16  }
  0x2b   :  { %262 = vsyncadd [#allocation4], 4294967280 }
  0x2c   :  { %263 = dma.done.wait [#allocation3], 128  }
  0x2d   :  { %264 = vsyncadd [#allocation3], 4294967168 }
  0x2e   :  { %265 = dma.done.wait [#allocation7], 256  }
  0x2f   :  { %266 = vsyncadd [#allocation7], 4294967040 }
  0x30   :  { %56 = sfence }
  0x31   :  { %v58_v0 = vld [vmem:[#allocation6] sm:$0xff]  ;;  %v59_v1 = vld [vmem:[#allocation6 + $0x8] sm:$0xff]  ;;  %v272_v2 = vmov 0.0|0.0   ;;  %vm273_vm0 = vmmov 0   ;;  %v274_v4 = vmov 0.0   ;;  %v57_v5 = vld [vmem:[#allocation5] sm:$0xff]  ;;  %v162_v20 = vlaneseq }
  0x32   :  { %192 = vmatprep.subr.bf16.mxu0 %v272_v2  ;;  %v193_v3 = vpack.c.bf16 %v59_v1, %v58_v0  ;;  %189 = vmatprep.mubr.msk.f32.mxu0 %vm273_vm0, %v274_v4  ;;  %vm67_vm1 = vcmask 130048   ;;  %v178_v6 = vld [vmem:[%s353_s3] ss:$0 sm:$0xff]  ;;  %vm150_vm2 = vcmask 261120   ;;  %s154_s30 = sld [smem:[#allocation2]]  ;;  %s181_s3 = sld [smem:[#allocation2 + $0x1]] }
  0x33   :  { %v180_v10 = vld [vmem:[%s354_s4] ss:$0 sm:$0xff]  ;;  %v163_v22 = vand.u32 127, %v162_v20  ;;  %vm169_vm4 = vcmask 15360  }
  0x34   :  { %194 = vmatpush3.bf16.msra.mxu0 %v193_v3 }
  0x35   :  { %vm164_vm3 = vcmp.eq.s32.totalorder %v163_v22, 0 }
  0x37   :  { %190 = vmatmul.mubr.msk.f32.vlgmr.msra.gmra.mrb[0].mxu0 %vm67_vm1, %v57_v5 }
  0x38   :  { %v155_v14 = vstv %s154_s30  ;;  %v166_v23 = vstv %s181_s3 }
  0x39   :  { %v167_v24 = vsel %vm164_vm3, 1.0, %v166_v23 }
 0x10a   :  { %v137_v7 = vpop.f32.mrb[0].mxu0 }
 0x10b   :  { %v138_v8 = vadd.f32 %v178_v6, %v137_v7  ;;  %v191_v9 = vpop.f32.mrb[1].mxu0 }
 0x10d   :  { %v141_v11 = vmax.f32 %v138_v8, 0.0 }
 0x10f   :  { %v149_v12 = vmul.f32 %v180_v10, %v141_v11 }
 0x111   :  { %v151_v13 = vsel %vm150_vm2, %v149_v12, 0.0 }
 0x112   :  { %152 = vadd.xlane.f32.xlu0 %v151_v13 }
 0x19f   :  { %v153_v15 = vpop.xlane.xlu0 %152 }
 0x1a0   :  { %v156_v16 = vadd.f32 %v155_v14, %v153_v15 }
 0x1a2   :  { %v157_v17 = vsub.f32 0.0, %v156_v16 }
 0x1a4   :  { %v158_v18 = vmul.f32 1.442695, %v157_v17 }
 0x1a6   :  { %203 = vpow2.f32 %v158_v18 }
 0x1b0   :  { %v204_v19 = vpop.eup %203 }
 0x1b1   :  { %v160_v21 = vadd.f32 1.0, %v204_v19 }
 0x1b3   :  { %205 = vrcp.f32 %v160_v21 }
 0x1bd   :  { %v206_v25 = vpop.eup %205 }
 0x1be   :  { %v168_v26 = vmul.f32 %v206_v25, %v167_v24 }
 0x1c0   :  { %170 = vst.msk [vmem:[%s355_s5] sm:$0xff] %vm169_vm4, %v168_v26 }
 0x1c1   :  { %175 = vsyncpa [#allocation3], 1 }
 0x1c2   :  { %176 = vsyncpa [#allocation7], 1 }
 0x1c3   :  { %177 = vsyncpa [#allocation4], 1 }

// kernel: tpu_custom_call.1
= control target key start
LH: loop header
LB: loop body
LE: loop exit
PB: predicated region body
PF: predicated region fallthrough
CT: control target
= control target key end

     0   :  { %10 = vsyncpa [#allocation4], 0  ;;  %s350_s0 = inlined_call_operand.hbm [shape: f32[2], index: 0, kind: input, shape index: {}]   ;;  %s351_s1 = inlined_call_operand.hbm [shape: f32[8,16], index: 1, kind: input, shape index: {}]   ;;  %s352_s2 = inlined_call_operand.hbm [shape: f32[16,32], index: 2, kind: input, shape index: {}]   ;;  %s353_s3 = inlined_call_operand.vmem [shape: f32[1,32], index: 3, kind: input, shape index: {}]   ;;  %s354_s4 = inlined_call_operand.vmem [shape: f32[1,32], index: 4, kind: input, shape index: {}]   ;;  %s355_s5 = inlined_call_operand.vmem [shape: f32[8,2], index: 5, kind: output, shape index: {}]  }
   0x1   :  { %11 = vsyncpa [#allocation3], 0 }
   0x2   :  { %12 = vsyncpa [#allocation7], 0  ;;  %s207_s20 = scalar_lea.hbm %s350_s0, 16 }
   0x3   :  { %p208_p0 = scmp.ne.s32.totalorder %s350_s0, %s207_s20  ;;  %p211_p1 = scmp.lt.u32.totalorder %s207_s20, %s350_s0 }
   0x5   :  { %p213_p2 = pnand %p211_p1, %p208_p0 }
   0x7   :  { %216 = shalt.err (!%p213_p2)
}
   0x8   :  { %s267_s25 = smov [#allocation2]   ;;  %s268_s28 = smov [#allocation5]  }
   0x9   :  { %20 = dma.hbm_to_smem %s350_s0, 16, %s267_s25, [#allocation4]  }
   0xa   :  { %s27_s29 = sshll.u32 %s268_s28, 4  ;;  %s269_s30 = smov [#allocation6]   ;;  %s28_s29 = int_to_ptr.vmem [resolvable:$true] %s27_s29 }
   0xb   :  { %s36_s6 = sshll.u32 %s269_s30, 4  ;;  %s217_s9 = scalar_lea.hbm %s351_s1, 128  ;;  %s37_s6 = int_to_ptr.vmem [resolvable:$true] %s36_s6 }
   0xc   :  { %p218_p3 = scmp.ne.s32.totalorder %s351_s1, %s217_s9  ;;  %p221_p4 = scmp.lt.u32.totalorder %s217_s9, %s351_s1 }
   0xe   :  { %p223_p5 = pnand %p221_p4, %p218_p3 }
  0x10   :  { %226 = shalt.err (!%p223_p5)
}
  0x11   :  { %s227_s0 = scalar_lea.vmem %s28_s29, 128  ;;  %p232_p7 = scmp.lt.s32.totalorder %s28_s29, %s28_s29 }
  0x12   :  { %p228_p6 = scmp.ne.s32.totalorder %s28_s29, %s227_s0  ;;  %p233_p8 = scmp.lt.s32.totalorder %s227_s0, %s227_s0 }
  0x14   :  { %p234_p9 = por %p233_p8, %p232_p7 }
  0x16   :  { %p235_p10 = pnand %p234_p9, %p228_p6 }
  0x18   :  { %238 = shalt.err (!%p235_p10)
}
  0x19   :  { %30 = dma.hbm_to_vmem [thread:$0]  %s351_s1, 128, %s28_s29, [#allocation3]  }
  0x1a   :  { %s239_s18 = scalar_lea.hbm %s352_s2, 256 }
  0x1b   :  { %p240_p11 = scmp.ne.s32.totalorder %s352_s2, %s239_s18  ;;  %p243_p12 = scmp.lt.u32.totalorder %s239_s18, %s352_s2 }
  0x1d   :  { %p245_p13 = pnand %p243_p12, %p240_p11 }
  0x1f   :  { %248 = shalt.err (!%p245_p13)
}
  0x20   :  { %s249_s23 = scalar_lea.vmem %s37_s6, 256  ;;  %p254_p1 = scmp.lt.s32.totalorder %s37_s6, %s37_s6 }
  0x21   :  { %p250_p0 = scmp.ne.s32.totalorder %s37_s6, %s249_s23  ;;  %p255_p2 = scmp.lt.s32.totalorder %s249_s23, %s249_s23 }
  0x23   :  { %p256_p3 = por %p255_p2, %p254_p1 }
  0x25   :  { %p257_p4 = pnand %p256_p3, %p250_p0 }
  0x27   :  { %260 = shalt.err (!%p257_p4)
}
  0x28   :  { %s270_s1 = smov 128   ;;  %s271_s24 = smov 8  }
  0x29   :  { %42 = dma.hbm_to_vmem [thread:$0]  %s352_s2, 256, %s37_s6, [#allocation7], %s270_s1, %s270_s1, %s271_s24  }
  0x2a   :  { %261 = dma.done.wait [#allocation4], 16  }
  0x2b   :  { %262 = vsyncadd [#allocation4], 4294967280 }
  0x2c   :  { %263 = dma.done.wait [#allocation3], 128  }
  0x2d   :  { %264 = vsyncadd [#allocation3], 4294967168 }
  0x2e   :  { %265 = dma.done.wait [#allocation7], 256  }
  0x2f   :  { %266 = vsyncadd [#allocation7], 4294967040 }
  0x30   :  { %56 = sfence }
  0x31   :  { %v58_v0 = vld [vmem:[#allocation6] sm:$0xff]  ;;  %v59_v1 = vld [vmem:[#allocation6 + $0x8] sm:$0xff]  ;;  %v272_v2 = vmov 0.0|0.0   ;;  %vm273_vm0 = vmmov 0   ;;  %v274_v4 = vmov 0.0   ;;  %v57_v5 = vld [vmem:[#allocation5] sm:$0xff]  ;;  %v162_v20 = vlaneseq }
  0x32   :  { %192 = vmatprep.subr.bf16.mxu0 %v272_v2  ;;  %v193_v3 = vpack.c.bf16 %v59_v1, %v58_v0  ;;  %189 = vmatprep.mubr.msk.f32.mxu0 %vm273_vm0, %v274_v4  ;;  %vm67_vm1 = vcmask 130048   ;;  %v178_v6 = vld [vmem:[%s353_s3] ss:$0 sm:$0xff]  ;;  %vm150_vm2 = vcmask 261120   ;;  %s154_s30 = sld [smem:[#allocation2]]  ;;  %s181_s3 = sld [smem:[#allocation2 + $0x1]] }
  0x33   :  { %v180_v10 = vld [vmem:[%s354_s4] ss:$0 sm:$0xff]  ;;  %v163_v22 = vand.u32 127, %v162_v20  ;;  %vm169_vm4 = vcmask 15360  }
  0x34   :  { %194 = vmatpush3.bf16.msra.mxu0 %v193_v3 }
  0x35   :  { %vm164_vm3 = vcmp.eq.s32.totalorder %v163_v22, 0 }
  0x37   :  { %190 = vmatmul.mubr.msk.f32.vlgmr.msra.gmra.mrb[0].mxu0 %vm67_vm1, %v57_v5 }
  0x38   :  { %v155_v14 = vstv %s154_s30  ;;  %v166_v23 = vstv %s181_s3 }
  0x39   :  { %v167_v24 = vsel %vm164_vm3, 1.0, %v166_v23 }
 0x10a   :  { %v137_v7 = vpop.f32.mrb[0].mxu0 }
 0x10b   :  { %v138_v8 = vadd.f32 %v178_v6, %v137_v7  ;;  %v191_v9 = vpop.f32.mrb[1].mxu0 }
 0x10d   :  { %v141_v11 = vmax.f32 %v138_v8, 0.0 }
 0x10f   :  { %v149_v12 = vmul.f32 %v180_v10, %v141_v11 }
 0x111   :  { %v151_v13 = vsel %vm150_vm2, %v149_v12, 0.0 }
 0x112   :  { %152 = vadd.xlane.f32.xlu0 %v151_v13 }
 0x19f   :  { %v153_v15 = vpop.xlane.xlu0 %152 }
 0x1a0   :  { %v156_v16 = vadd.f32 %v155_v14, %v153_v15 }
 0x1a2   :  { %v157_v17 = vsub.f32 0.0, %v156_v16 }
 0x1a4   :  { %v158_v18 = vmul.f32 1.442695, %v157_v17 }
 0x1a6   :  { %203 = vpow2.f32 %v158_v18 }
 0x1b0   :  { %v204_v19 = vpop.eup %203 }
 0x1b1   :  { %v160_v21 = vadd.f32 1.0, %v204_v19 }
 0x1b3   :  { %205 = vrcp.f32 %v160_v21 }
 0x1bd   :  { %v206_v25 = vpop.eup %205 }
 0x1be   :  { %v168_v26 = vmul.f32 %v206_v25, %v167_v24 }
 0x1c0   :  { %170 = vst.msk [vmem:[%s355_s5] sm:$0xff] %vm169_vm4, %v168_v26 }
 0x1c1   :  { %175 = vsyncpa [#allocation3], 1 }
 0x1c2   :  { %176 = vsyncpa [#allocation7], 1 }
 0x1c3   :  { %177 = vsyncpa [#allocation4], 1 }

</bundles_post_ra>
